<compile_context>
chip_gen: v7x
topology: tpu7x:2x2x1
jax: 0.10.0
libtpu: 0.0.40
codegen_flags: <defaults>
</compile_context>

<pallas_src>
import jax
import jax.numpy as jnp
from jax import lax
from jax.experimental import pallas as pl
from jax.experimental.pallas import tpu as pltpu


def nematode_mlp_kernel(x_ref, w1_ref, w2_ref, o_ref):
    """Fused bias-free 2-layer MLP in the module's native (batch, feature) layout.

    x_ref : (tb, S)   activation tile (batch on sublanes, features on lanes)
    w1_ref: (H, S)    Linear1.weight, PyTorch (out, in) orientation
    w2_ref: (A, H)    Linear2.weight, PyTorch (out, in) orientation
    o_ref : (tb, A)   output tile (batch on sublanes)

    NOTE(partial tiles): every output row depends only on its own input row, so
    padded/garbage rows in the last (partial) batch tile never contaminate
    valid rows and the out-of-range writeback is masked by Pallas.  Do not add
    any cross-row reduction/normalization here without revisiting this.
    """
    x = x_ref[...]
    # (tb, S) x (H, S), contracting S with S -> (tb, H); f32 MXU accumulation.
    h = lax.dot_general(x, w1_ref[...],
                        dimension_numbers=(((1,), (1,)), ((), ())),
                        preferred_element_type=jnp.float32)
    # ReLU on the f32 accumulator (VPU; elementwise stays f32 -> v5e-safe).
    h = jnp.maximum(h, 0.0)
    # (tb, H) x (A, H), contracting H with H -> (tb, A).
    # Cast the hidden to the weight dtype only for the MXU feed (no-op for f32).
    o = lax.dot_general(h.astype(w2_ref.dtype), w2_ref[...],
                        dimension_numbers=(((1,), (1,)), ((), ())),
                        preferred_element_type=jnp.float32)
    o_ref[...] = o.astype(o_ref.dtype)


def _pick_batch_tile(B):
    """Batch tile (sublane axis).

    For large batches aim for >= 8 grid steps so BlockSpec double-buffering
    overlaps DMA-in / MXU / DMA-out on every generation and both v7x
    TensorCores still get several steps each after megacore sharding.  Cap at
    16384 rows so the per-step VMEM footprint stays a few MiB (well inside
    v7x's 64 MiB physical / 32 MiB scoped VMEM and v5e's 16 MiB scoped default).
    """
    if B <= 1024:
        return B                               # single step; full-extent block is legal
    tile = B // 8                              # >= 8 grid steps
    tile = max(512, min(16384, (tile // 8) * 8))   # sublane-aligned
    return tile


def nematode_forward(x, w1, w2, *, batch_tile=None):
    """Forward pass of Nematode.

    x : (B, state_dim)            -- same features-last layout as the module
    w1: (hidden, state_dim)       -- torch Linear1.weight (out, in)
    w2: (action_dim, hidden)      -- torch Linear2.weight (out, in)
    returns (B, action_dim) in x.dtype (no wrapper-side layout/dtype passes).
    """
    B, S = x.shape
    H, S_w = w1.shape
    A, H_w = w2.shape
    assert S == S_w and H == H_w, "weight shapes inconsistent with x"

    tb = _pick_batch_tile(B) if batch_tile is None else batch_tile
    # Batch sits on the sublane axis: a partial-coverage tile size must be a
    # multiple of 8 (or exactly B) to satisfy the (8,128) BlockSpec rule.
    assert tb == B or tb % 8 == 0, \
        "batch_tile must equal B or be a multiple of 8 (sublane width)"
    grid = (pl.cdiv(B, tb),)

    out_dtype = x.dtype
    x_bytes = jnp.dtype(x.dtype).itemsize
    w_bytes = jnp.dtype(w1.dtype).itemsize
    o_bytes = jnp.dtype(out_dtype).itemsize

    cost = pl.CostEstimate(
        flops=2 * B * (S * H + H * A),
        transcendentals=0,
        bytes_accessed=int(B * S * x_bytes + B * A * o_bytes
                           + (H * S + A * H) * w_bytes),
    )

    # Explicit VMEM budget: double-buffered x & out tiles + f32 hidden + resident
    # weights, with 2x headroom.  Stays a few MiB at the 16384-row tile cap.
    vmem_bytes = 2 * (2 * tb * S * x_bytes          # x tile, double-buffered
                      + 2 * tb * A * o_bytes        # out tile, double-buffered
                      + tb * H * 4                  # f32 hidden intermediate
                      + (H * S + A * H) * w_bytes)  # resident weights
    vmem_bytes = int(min(max(vmem_bytes, 4 << 20), 32 << 20))

    return pl.pallas_call(
        nematode_mlp_kernel,
        out_shape=jax.ShapeDtypeStruct((B, A), out_dtype),
        grid_spec=pl.GridSpec(
            grid=grid,
            in_specs=[
                pl.BlockSpec((tb, S), lambda i: (i, 0)),   # batch-tiled activations
                pl.BlockSpec((H, S), lambda i: (0, 0)),    # W1 resident across grid
                pl.BlockSpec((A, H), lambda i: (0, 0)),    # W2 resident across grid
            ],
            out_specs=pl.BlockSpec((tb, A), lambda i: (i, 0)),
        ),
        compiler_params=pltpu.CompilerParams(
            dimension_semantics=("parallel",),
            vmem_limit_bytes=vmem_bytes),
        cost_estimate=cost,
    )(x, w1, w2)


def reference_forward(x, w1, w2):
    """Pure-JAX reference matching the PyTorch module (weights in (out, in))."""
    return jnp.maximum(x @ w1.T, 0.0) @ w2.T


if __name__ == "__main__":
    # Small shapes consistent with the module: state_dim=32 -> hidden=16 -> action_dim=8
    batch, state_dim, action_dim = 8, 32, 8
    hidden = state_dim // 2

    key = jax.random.PRNGKey(0)
    kx, k1, k2 = jax.random.split(key, 3)

    x = jax.random.normal(kx, (batch, state_dim), dtype=jnp.float32)
    # PyTorch Linear weight orientation: (out_features, in_features).
    w1 = jax.random.normal(k1, (hidden, state_dim), dtype=jnp.float32) * 0.1
    w2 = jax.random.normal(k2, (action_dim, hidden), dtype=jnp.float32) * 0.1

    ref = reference_forward(x, w1, w2)

    # f32 native path: exact match to the reference, output dtype == input dtype.
    out = jax.block_until_ready(nematode_forward(x, w1, w2))
    assert out.shape == (batch, action_dim)
    assert out.dtype == x.dtype
    assert jnp.allclose(out, ref, atol=1e-5, rtol=1e-5)

    # Multi-step grid with a partial last tile: exercises the pipelined path
    # (3 grid steps of 128 rows, masked writeback on the partial last block).
    xb = jax.random.normal(kx, (300, state_dim), dtype=jnp.float32)
    out_big = jax.block_until_ready(nematode_forward(xb, w1, w2, batch_tile=128))
    assert jnp.allclose(out_big, reference_forward(xb, w1, w2),
                        atol=1e-5, rtol=1e-5)

    # bf16-native path: caller already holds bf16 tensors -> bf16 HBM traffic
    # end to end (no wrapper casts), f32 MXU accumulation, bf16 output.
    xb16 = xb.astype(jnp.bfloat16)
    w1b16 = w1.astype(jnp.bfloat16)
    w2b16 = w2.astype(jnp.bfloat16)
    out_b16 = jax.block_until_ready(
        nematode_forward(xb16, w1b16, w2b16, batch_tile=128))
    assert out_b16.dtype == jnp.bfloat16
    assert jnp.allclose(out_b16.astype(jnp.float32),
                        reference_forward(xb, w1, w2), atol=5e-2, rtol=5e-2)

    print("KERNEL_OK")
</pallas_src>

<mosaic_0001>
module attributes {stable_mosaic.version = 11 : i64} {
  func.func @nematode_mlp_kernel(%arg0: i32, %arg1: memref<8x32xf32, #tpu.memory_space<vmem>>, %arg2: memref<16x32xf32, #tpu.memory_space<vmem>>, %arg3: memref<8x16xf32, #tpu.memory_space<vmem>>, %arg4: memref<8x8xf32, #tpu.memory_space<vmem>>) attributes {dimension_semantics = [#tpu.dimension_semantics<parallel>], iteration_bounds = array<i64: 1>, scalar_prefetch = 0 : i64, scratch_operands = 0 : i64, tpu.core_type = #tpu.core_type<tc>, window_params = [{transform_indices = @transform_0, window_bounds = array<i64: 8, 32>}, {pipeline_mode = #tpu.pipeline_mode<synchronous>, transform_indices = @transform_1, window_bounds = array<i64: 16, 32>}, {pipeline_mode = #tpu.pipeline_mode<synchronous>, transform_indices = @transform_2, window_bounds = array<i64: 8, 16>}, {transform_indices = @transform_3, window_bounds = array<i64: 8, 8>}]} {
    %c0 = arith.constant 0 : index
    %c0_0 = arith.constant 0 : index
    %0 = vector.load %arg1[%c0, %c0_0] : memref<8x32xf32, #tpu.memory_space<vmem>>, vector<8x32xf32>
    %c0_1 = arith.constant 0 : index
    %c0_2 = arith.constant 0 : index
    %1 = vector.load %arg2[%c0_1, %c0_2] : memref<16x32xf32, #tpu.memory_space<vmem>>, vector<16x32xf32>
    %cst = arith.constant dense<0.000000e+00> : vector<8x16xf32>
    %2 = tpu.matmul %0, %1, %cst {dimension_numbers = #tpu.dot_dimension_numbers<[1], [1], [0], [0], [0, 0, 1, 0], [], []>} : vector<8x32xf32>, vector<16x32xf32>, vector<8x16xf32> -> vector<8x16xf32>
    %cst_3 = arith.constant 0.000000e+00 : f32
    %3 = vector.broadcast %cst_3 : f32 to vector<8x16xf32>
    %4 = arith.maximumf %2, %3 : vector<8x16xf32>
    %c0_4 = arith.constant 0 : index
    %c0_5 = arith.constant 0 : index
    %5 = vector.load %arg3[%c0_4, %c0_5] : memref<8x16xf32, #tpu.memory_space<vmem>>, vector<8x16xf32>
    %cst_6 = arith.constant dense<0.000000e+00> : vector<8x8xf32>
    %6 = tpu.matmul %4, %5, %cst_6 {dimension_numbers = #tpu.dot_dimension_numbers<[1], [1], [0], [0], [0, 0, 1, 0], [], []>} : vector<8x16xf32>, vector<8x16xf32>, vector<8x8xf32> -> vector<8x8xf32>
    %c0_7 = arith.constant 0 : index
    %c0_8 = arith.constant 0 : index
    %7 = vector.load %arg4[%c0_7, %c0_8] : memref<8x8xf32, #tpu.memory_space<vmem>>, vector<8x8xf32>
    tpu.vector_store %arg4[%c0_7, %c0_8], %6 {strides = array<i32>} : memref<8x8xf32, #tpu.memory_space<vmem>>, vector<8x8xf32>,
    return
  }
  func.func @transform_0(%arg0: i32) -> (i32, i32) {
    %c0_i32 = arith.constant 0 : i32
    %c0_i32_0 = arith.constant 0 : i32
    return %arg0, %c0_i32 : i32, i32
  }
  func.func @transform_1(%arg0: i32) -> (i32, i32) {
    %c0_i32 = arith.constant 0 : i32
    %c0_i32_0 = arith.constant 0 : i32
    %c0_i32_1 = arith.constant 0 : i32
    return %c0_i32, %c0_i32_0 : i32, i32
  }
  func.func @transform_2(%arg0: i32) -> (i32, i32) {
    %c0_i32 = arith.constant 0 : i32
    %c0_i32_0 = arith.constant 0 : i32
    %c0_i32_1 = arith.constant 0 : i32
    return %c0_i32, %c0_i32_0 : i32, i32
  }
  func.func @transform_3(%arg0: i32) -> (i32, i32) {
    %c0_i32 = arith.constant 0 : i32
    %c0_i32_0 = arith.constant 0 : i32
    return %arg0, %c0_i32 : i32, i32
  }
}

</mosaic_0001>

<bundles_post_ra>
// kernel: tpu_custom_call.1
= control target key start
LH: loop header
LB: loop body
LE: loop exit
PB: predicated region body
PF: predicated region fallthrough
CT: control target
= control target key end

     0   :  { %8 = vsyncpa [#allocation3], 0  ;;  %s438_s0 = inlined_call_operand.hbm [shape: f32[8,32], index: 0, kind: input, shape index: {}]   ;;  %s439_s1 = inlined_call_operand.hbm [shape: f32[16,32], index: 1, kind: input, shape index: {}]   ;;  %s440_s2 = inlined_call_operand.hbm [shape: f32[8,16], index: 2, kind: input, shape index: {}]   ;;  %s441_s3 = inlined_call_operand.hbm [shape: f32[8,8], index: 3, kind: output, shape index: {}]  }
   0x1   :  { %9 = vsyncpa [#allocation6], 0 }
   0x2   :  { %10 = vsyncpa [#allocation4], 0  ;;  %s361_s12 = smov [#allocation5]   ;;  %s267_s16 = scalar_lea.hbm %s439_s1, 256 }
   0x3   :  { %s26_s13 = sshll.u32 %s361_s12, 4  ;;  %p268_p0 = scmp.ne.s32.totalorder %s439_s1, %s267_s16  ;;  %s27_s13 = int_to_ptr.vmem [resolvable:$true] %s26_s13 }
   0x4   :  { %p271_p1 = scmp.lt.u32.totalorder %s267_s16, %s439_s1 }
   0x6   :  { %p273_p2 = pnand %p271_p1, %p268_p0 }
   0x8   :  { %276 = shalt.err (!%p273_p2)
}
   0x9   :  { %s277_s21 = scalar_lea.vmem %s27_s13, 256  ;;  %p282_p4 = scmp.lt.s32.totalorder %s27_s13, %s27_s13 }
   0xa   :  { %p278_p3 = scmp.ne.s32.totalorder %s27_s13, %s277_s21  ;;  %p283_p5 = scmp.lt.s32.totalorder %s277_s21, %s277_s21 }
   0xc   :  { %p284_p6 = por %p283_p5, %p282_p4 }
   0xe   :  { %p285_p7 = pnand %p284_p6, %p278_p3 }
  0x10   :  { %288 = shalt.err (!%p285_p7)
}
  0x11   :  { %s362_s22 = smov 128   ;;  %s363_s23 = smov 8  }
  0x12   :  { %32 = dma.hbm_to_vmem [thread:$0]  %s439_s1, 256, %s27_s13, [#allocation6], %s362_s22, %s362_s22, %s363_s23  }
  0x13   :  { %s364_s26 = smov [#allocation2]   ;;  %s365_s28 = smov [#allocation7]  }
  0x14   :  { %s17_s27 = sshll.u32 %s364_s26, 4  ;;  %s39_s29 = sshll.u32 %s365_s28, 4  ;;  %s18_s27 = int_to_ptr.vmem [resolvable:$true] %s17_s27  ;;  %s40_s29 = int_to_ptr.vmem [resolvable:$true] %s39_s29 }
  0x15   :  { %s289_s5 = scalar_lea.hbm %s438_s0, 128 }
  0x16   :  { %p290_p8 = scmp.ne.s32.totalorder %s438_s0, %s289_s5  ;;  %p293_p9 = scmp.lt.u32.totalorder %s289_s5, %s438_s0 }
  0x18   :  { %p295_p10 = pnand %p293_p9, %p290_p8 }
  0x1a   :  { %298 = shalt.err (!%p295_p10)
}
  0x1b   :  { %s299_s1 = scalar_lea.vmem %s18_s27, 128  ;;  %p304_p12 = scmp.lt.s32.totalorder %s18_s27, %s18_s27 }
  0x1c   :  { %p300_p11 = scmp.ne.s32.totalorder %s18_s27, %s299_s1  ;;  %p305_p13 = scmp.lt.s32.totalorder %s299_s1, %s299_s1 }
  0x1e   :  { %p306_p0 = por %p305_p13, %p304_p12 }
  0x20   :  { %p307_p1 = pnand %p306_p0, %p300_p11 }
  0x22   :  { %310 = shalt.err (!%p307_p1)
}
  0x23   :  { %20 = dma.hbm_to_vmem [thread:$0]  %s438_s0, 128, %s18_s27, [#allocation3]  }
  0x24   :  { %s311_s14 = scalar_lea.hbm %s440_s2, 128 }
  0x25   :  { %p312_p2 = scmp.ne.s32.totalorder %s440_s2, %s311_s14  ;;  %p315_p3 = scmp.lt.u32.totalorder %s311_s14, %s440_s2 }
  0x27   :  { %p317_p4 = pnand %p315_p3, %p312_p2 }
  0x29   :  { %320 = shalt.err (!%p317_p4)
}
  0x2a   :  { %s321_s19 = scalar_lea.vmem %s40_s29, 128  ;;  %p326_p6 = scmp.lt.s32.totalorder %s40_s29, %s40_s29 }
  0x2b   :  { %p322_p5 = scmp.ne.s32.totalorder %s40_s29, %s321_s19  ;;  %p327_p7 = scmp.lt.s32.totalorder %s321_s19, %s321_s19 }
  0x2d   :  { %p328_p8 = por %p327_p7, %p326_p6 }
  0x2f   :  { %p329_p9 = pnand %p328_p8, %p322_p5 }
  0x31   :  { %332 = shalt.err (!%p329_p9)
}
  0x32   :  { %42 = dma.hbm_to_vmem [thread:$0]  %s440_s2, 128, %s40_s29, [#allocation6]  }
  0x33   :  { %355 = dma.done.wait [#allocation3], 128  }
  0x34   :  { %356 = vsyncadd [#allocation3], 4294967168 }
  0x35   :  { %357 = dma.done.wait [#allocation6], 384  }
  0x36   :  { %358 = vsyncadd [#allocation6], 4294966912  ;;  %v366_v0 = vmov 0.0|0.0   ;;  %vm367_vm0 = vmmov 0   ;;  %v368_v1 = vmov 0.0   ;;  %vm55_vm1 = vcmask 261120  }
  0x37   :  { %254 = vmatprep.subr.bf16.mxu0 %v366_v0  ;;  %246 = vmatprep.mubr.msk.f32.mxu0 %vm367_vm0, %v368_v1  ;;  %v53_v2 = vld [vmem:[#allocation5] sm:$0xff]  ;;  %v54_v3 = vld [vmem:[#allocation5 + $0x8] sm:$0xff]  ;;  %vm256_vm2 = vmpackc.low %vm55_vm1, %vm55_vm1  ;;  %vm137_vm3 = vcmask 130048   ;;  %s369_s2 = smov [#allocation8]   ;;  %vm214_vm4 = vcmask 64512  }
  0x38   :  { %249 = vmatprep.subr.mxu1 %v368_v1  ;;  %251 = vmatprep.mubr.msk.f32.mxu1 %vm367_vm0, %v368_v1  ;;  %v255_v4 = vpack.c.bf16 %v54_v3, %v53_v2  ;;  %v52_v5 = vld [vmem:[#allocation2] sm:$0xff]  ;;  %v136_v6 = vld [vmem:[#allocation7] sm:$0xff]  ;;  %s222_s21 = sshll.u32 %s369_s2, 4  ;;  %s223_s21 = int_to_ptr.vmem [resolvable:$true] %s222_s21 }
  0x39   :  { %250 = vmatpush3.xpose.msk.msra.mxu1 %vm137_vm3, %v136_v6  ;;  %s333_s22 = scalar_lea.vmem %s223_s21, 128  ;;  %p338_p11 = scmp.lt.s32.totalorder %s223_s21, %s223_s21 }
  0x3a   :  { %257 = vmatpush3.bf16.xpose.msk.msra.mxu0 %vm256_vm2, %v255_v4  ;;  %p334_p10 = scmp.ne.s32.totalorder %s223_s21, %s333_s22  ;;  %p339_p12 = scmp.lt.s32.totalorder %s333_s22, %s333_s22 }
  0x3c   :  { %p340_p13 = por %p339_p12, %p338_p11 }
  0x3e   :  { %p341_p0 = pnand %p340_p13, %p334_p10 }
  0x41   :  { %247 = vmatmul.mubr.msk.f32.vlgmr.msra.gmra.mrb[0].mxu0 %vm55_vm1, %v52_v5 }
 0x114   :  { %v131_v7 = vpop.f32.mrb[0].mxu0 }
 0x115   :  { %v135_v8 = vmax.f32 %v131_v7, 0.0  ;;  %v248_v9 = vpop.f32.mrb[1].mxu0 }
 0x117   :  { %252 = vmatmul.mubr.msk.f32.vlgmr.msra.gmra.mrb[0].mxu1 %vm137_vm3, %v135_v8 }
 0x1ea   :  { %v210_v10 = vpop.f32.mrb[0].mxu1 }
 0x1eb   :  { %v253_v11 = vpop.f32.mrb[1].mxu1  ;;  %215 = vst.msk [vmem:[#allocation8] sm:$0xff] %vm214_vm4, %v210_v10 }
 0x1ec   :  { %344 = shalt.err (!%p341_p0)
}
 0x1ed   :  { %s345_s25 = scalar_lea.hbm %s441_s3, 128 }
 0x1ee   :  { %p346_p1 = scmp.ne.s32.totalorder %s441_s3, %s345_s25  ;;  %p349_p2 = scmp.lt.u32.totalorder %s345_s25, %s441_s3 }
 0x1f0   :  { %p351_p3 = pnand %p349_p2, %p346_p1 }
 0x1f2   :  { %354 = shalt.err (!%p351_p3)
}
 0x1f3   :  { %225 = dma.vmem_to_hbm [thread:$0]  %s223_s21, 128, %s441_s3, [#allocation4]  }
 0x1f4   :  { %359 = dma.done.wait [#allocation4], 128  }
 0x1f5   :  { %360 = vsyncadd [#allocation4], 4294967168 }
 0x1f6   :  { %229 = vsyncpa [#allocation3], 1 }
 0x1f7   :  { %230 = vsyncpa [#allocation6], 1 }
 0x1f8   :  { %231 = vsyncpa [#allocation4], 1 }

</bundles_post_ra>
